<compile_context>
chip_gen: v7x
topology: tpu7x:2x2x1
jax: 0.10.0
libtpu: 0.0.40
codegen_flags: <defaults>
</compile_context>

<pallas_src>
import functools

import jax
import jax.numpy as jnp
from jax import lax
from jax.experimental import pallas as pl
from jax.experimental.pallas import tpu as pltpu


def _mha_kernel(x_ref, wqkv_ref, bqkv_ref, wo_ref, bo_ref, o_ref, *,
                n_batch: int, embed_dim: int):
    """Single-invocation single-head self-attention.

    x_ref / o_ref : (L, N, E) in VMEM (PyTorch seq, batch, embed layout).
    wqkv_ref      : (E, 3E)  fused [Wq^T | Wk^T | Wv^T]
    bqkv_ref      : (1, 3E)  fused [bq | bk | bv]
    wo_ref        : (E, E)   Wo^T
    bo_ref        : (1, E)
    """
    E = embed_dim
    wqkv = wqkv_ref[...]
    bqkv = bqkv_ref[...]
    wo = wo_ref[...]
    bo = bo_ref[...]
    scale = jnp.float32(1.0) / jnp.sqrt(jnp.float32(E))  # 1/sqrt(head_dim), head_dim == E

    # Batch is tiny; a static unrolled loop keeps every matmul a clean 2-D MXU op
    # and avoids batched-einsum relayouts.
    for n in range(n_batch):
        xn = x_ref[:, n, :].astype(jnp.float32)                        # (L, E)

        # Fused QKV projection: one (L, E) x (E, 3E) matmul instead of three.
        qkv = jnp.dot(xn, wqkv, preferred_element_type=jnp.float32) + bqkv  # (L, 3E)
        q = qkv[:, 0 * E:1 * E] * scale
        k = qkv[:, 1 * E:2 * E]
        v = qkv[:, 2 * E:3 * E]

        # scores[i, j] = sum_e q[i, e] * k[j, e]  (contract last dims, no k.T).
        s = lax.dot_general(q, k, (((1,), (1,)), ((), ())),
                            preferred_element_type=jnp.float32)        # (L, L)

        # Numerically-stable softmax over the key axis.
        m = jnp.max(s, axis=-1, keepdims=True)
        p = jnp.exp(s - m)
        denom = jnp.sum(p, axis=-1, keepdims=True)
        r = pl.reciprocal(denom, approx=True)        # EUP vrcp (off the VPU path)
        r = r * (2.0 - denom * r)                    # one Newton step -> ~f32 accuracy
        p = p * r

        ctx = jnp.dot(p, v, preferred_element_type=jnp.float32)        # (L, E)

        # Output projection.
        out = jnp.dot(ctx, wo, preferred_element_type=jnp.float32) + bo
        o_ref[:, n, :] = out.astype(o_ref.dtype)


@jax.jit
def self_attention_pallas(x_lne, in_proj_weight, in_proj_bias,
                          out_proj_weight, out_proj_bias):
    """Matches nn.MultiheadAttention(E, 1)(x, x, x)[0], batch_first=False.

    x_lne:            (L, N, E) float32
    in_proj_weight:   (3E, E)  (PyTorch layout: rows = [Wq; Wk; Wv])
    in_proj_bias:     (3E,)
    out_proj_weight:  (E, E)
    out_proj_bias:    (E,)
    """
    L, N, E = x_lne.shape

    # One-time weight massaging (tiny tensors, outside the kernel): fuse Q/K/V and
    # pre-transpose so the kernel computes y = x @ W^T + b as plain x @ W_t + b.
    wqkv_t = in_proj_weight.T                      # (E, 3E)
    bqkv = in_proj_bias.reshape(1, 3 * E)
    wo_t = out_proj_weight.T                       # (E, E)
    bo = out_proj_bias.reshape(1, E)

    kernel = functools.partial(_mha_kernel, n_batch=N, embed_dim=E)
    vmem = pl.BlockSpec(memory_space=pltpu.MemorySpace.VMEM)

    return pl.pallas_call(
        kernel,
        out_shape=jax.ShapeDtypeStruct((L, N, E), x_lne.dtype),
        in_specs=[vmem, vmem, vmem, vmem, vmem],
        out_specs=vmem,
    )(x_lne, wqkv_t, bqkv, wo_t, bo)


def _reference(x_lne, in_proj_weight, in_proj_bias, out_proj_weight, out_proj_bias):
    """Pure-JAX replica of nn.MultiheadAttention(E, 1) self-attention forward."""
    L, N, E = x_lne.shape
    q = x_lne @ in_proj_weight[:E].T + in_proj_bias[:E]
    k = x_lne @ in_proj_weight[E:2 * E].T + in_proj_bias[E:2 * E]
    v = x_lne @ in_proj_weight[2 * E:].T + in_proj_bias[2 * E:]
    scale = 1.0 / jnp.sqrt(jnp.float32(E))
    s = jnp.einsum("lne,mne->nlm", q * scale, k)     # per-batch (L, L) scores
    p = jax.nn.softmax(s, axis=-1)
    ctx = jnp.einsum("nlm,mne->lne", p, v)
    return ctx @ out_proj_weight.T + out_proj_bias


if __name__ == "__main__":
    L, N, E = 8, 2, 32  # seq_len, batch, embed_dim
    key = jax.random.PRNGKey(0)
    kx, kw, kb, ko = jax.random.split(key, 4)

    x = jax.random.normal(kx, (L, N, E), jnp.float32)
    in_proj_weight = jax.random.normal(kw, (3 * E, E), jnp.float32) * 0.05
    in_proj_bias = jax.random.normal(kb, (3 * E,), jnp.float32) * 0.01
    out_proj_weight = jax.random.normal(ko, (E, E), jnp.float32) * 0.05
    out_proj_bias = jnp.zeros((E,), jnp.float32)

    out = self_attention_pallas(x, in_proj_weight, in_proj_bias,
                                out_proj_weight, out_proj_bias)
    out = jax.block_until_ready(out)

    ref = _reference(x, in_proj_weight, in_proj_bias, out_proj_weight, out_proj_bias)
    assert out.shape == (L, N, E)
    assert jnp.allclose(out, ref, atol=1e-5, rtol=1e-5), "mismatch vs reference"

    print("KERNEL_OK")
</pallas_src>

<mosaic_0001>
module attributes {stable_mosaic.version = 11 : i64} {
  func.func @_mha_kernel(%arg0: memref<8x2x32xf32, #tpu.memory_space<vmem>>, %arg1: memref<32x96xf32, #tpu.memory_space<vmem>>, %arg2: memref<1x96xf32, #tpu.memory_space<vmem>>, %arg3: memref<32x32xf32, #tpu.memory_space<vmem>>, %arg4: memref<1x32xf32, #tpu.memory_space<vmem>>, %arg5: memref<8x2x32xf32, #tpu.memory_space<vmem>>) attributes {dimension_semantics = [], scalar_prefetch = 0 : i64, scratch_operands = 0 : i64, tpu.core_type = #tpu.core_type<tc>} {
    %c0 = arith.constant 0 : index
    %c0_0 = arith.constant 0 : index
    %0 = vector.load %arg1[%c0, %c0_0] : memref<32x96xf32, #tpu.memory_space<vmem>>, vector<32x96xf32>
    %c0_1 = arith.constant 0 : index
    %c0_2 = arith.constant 0 : index
    %1 = vector.load %arg2[%c0_1, %c0_2] : memref<1x96xf32, #tpu.memory_space<vmem>>, vector<1x96xf32>
    %c0_3 = arith.constant 0 : index
    %c0_4 = arith.constant 0 : index
    %2 = vector.load %arg3[%c0_3, %c0_4] : memref<32x32xf32, #tpu.memory_space<vmem>>, vector<32x32xf32>
    %c0_5 = arith.constant 0 : index
    %c0_6 = arith.constant 0 : index
    %3 = vector.load %arg4[%c0_5, %c0_6] : memref<1x32xf32, #tpu.memory_space<vmem>>, vector<1x32xf32>
    %cst = arith.constant 3.200000e+01 : f32
    %4 = math.sqrt %cst : f32
    %cst_7 = arith.constant 1.000000e+00 : f32
    %5 = arith.divf %cst_7, %4 : f32
    %c0_8 = arith.constant 0 : index
    %c0_9 = arith.constant 0 : index
    %c0_10 = arith.constant 0 : index
    %6 = vector.load %arg0[%c0_8, %c0_9, %c0_10] : memref<8x2x32xf32, #tpu.memory_space<vmem>>, vector<8x1x32xf32>
    %7 = vector.shape_cast %6 : vector<8x1x32xf32> to vector<8x32xf32>
    %cst_11 = arith.constant dense<0.000000e+00> : vector<8x96xf32>
    %8 = tpu.matmul %7, %0, %cst_11 {dimension_numbers = #tpu.dot_dimension_numbers<[1], [0], [0], [1], [0, 0, 1, 1], [], []>} : vector<8x32xf32>, vector<32x96xf32>, vector<8x96xf32> -> vector<8x96xf32>
    %9 = vector.broadcast %1 : vector<1x96xf32> to vector<8x96xf32>
    %10 = arith.addf %8, %9 : vector<8x96xf32>
    %11 = vector.extract_strided_slice %10 {offsets = [0, 0], sizes = [8, 32], strides = [1, 1]} : vector<8x96xf32> to vector<8x32xf32>
    %12 = vector.broadcast %5 : f32 to vector<8x32xf32>
    %13 = arith.mulf %11, %12 : vector<8x32xf32>
    %14 = vector.extract_strided_slice %10 {offsets = [0, 32], sizes = [8, 32], strides = [1, 1]} : vector<8x96xf32> to vector<8x32xf32>
    %15 = vector.extract_strided_slice %10 {offsets = [0, 64], sizes = [8, 32], strides = [1, 1]} : vector<8x96xf32> to vector<8x32xf32>
    %cst_12 = arith.constant dense<0.000000e+00> : vector<8x8xf32>
    %16 = tpu.matmul %13, %14, %cst_12 {dimension_numbers = #tpu.dot_dimension_numbers<[1], [1], [0], [0], [0, 0, 1, 0], [], []>} : vector<8x32xf32>, vector<8x32xf32>, vector<8x8xf32> -> vector<8x8xf32>
    %cst_13 = arith.constant dense<0xFF800000> : vector<8xf32>
    %17 = vector.multi_reduction <maximumf>, %16, %cst_13 [1] : vector<8x8xf32> to vector<8xf32>
    %18 = vector.shape_cast %17 : vector<8xf32> to vector<8x1xf32>
    %19 = vector.broadcast %18 : vector<8x1xf32> to vector<8x8xf32>
    %20 = arith.subf %16, %19 : vector<8x8xf32>
    %21 = math.exp %20 : vector<8x8xf32>
    %cst_14 = arith.constant dense<0.000000e+00> : vector<8xf32>
    %22 = vector.multi_reduction <add>, %21, %cst_14 [1] : vector<8x8xf32> to vector<8xf32>
    %23 = vector.shape_cast %22 : vector<8xf32> to vector<8x1xf32>
    %24 = tpu.reciprocal %23 {approx = true} : vector<8x1xf32> -> vector<8x1xf32>
    %25 = arith.mulf %23, %24 : vector<8x1xf32>
    %cst_15 = arith.constant 2.000000e+00 : f32
    %26 = vector.broadcast %cst_15 : f32 to vector<8x1xf32>
    %27 = arith.subf %26, %25 : vector<8x1xf32>
    %28 = arith.mulf %24, %27 : vector<8x1xf32>
    %29 = vector.broadcast %28 : vector<8x1xf32> to vector<8x8xf32>
    %30 = arith.mulf %21, %29 : vector<8x8xf32>
    %cst_16 = arith.constant dense<0.000000e+00> : vector<8x32xf32>
    %31 = tpu.matmul %30, %15, %cst_16 {dimension_numbers = #tpu.dot_dimension_numbers<[1], [0], [0], [1], [0, 0, 1, 1], [], []>} : vector<8x8xf32>, vector<8x32xf32>, vector<8x32xf32> -> vector<8x32xf32>
    %cst_17 = arith.constant dense<0.000000e+00> : vector<8x32xf32>
    %32 = tpu.matmul %31, %2, %cst_17 {dimension_numbers = #tpu.dot_dimension_numbers<[1], [0], [0], [1], [0, 0, 1, 1], [], []>} : vector<8x32xf32>, vector<32x32xf32>, vector<8x32xf32> -> vector<8x32xf32>
    %33 = vector.broadcast %3 : vector<1x32xf32> to vector<8x32xf32>
    %34 = arith.addf %32, %33 : vector<8x32xf32>
    %c0_18 = arith.constant 0 : index
    %c0_19 = arith.constant 0 : index
    %c0_20 = arith.constant 0 : index
    %35 = vector.load %arg5[%c0_18, %c0_19, %c0_20] : memref<8x2x32xf32, #tpu.memory_space<vmem>>, vector<8x1x32xf32>
    %36 = vector.shape_cast %35 : vector<8x1x32xf32> to vector<8x32xf32>
    %37 = vector.shape_cast %34 : vector<8x32xf32> to vector<8x1x32xf32>
    tpu.vector_store %arg5[%c0_18, %c0_19, %c0_20], %37 {strides = array<i32>} : memref<8x2x32xf32, #tpu.memory_space<vmem>>, vector<8x1x32xf32>,
    %c0_21 = arith.constant 0 : index
    %c1 = arith.constant 1 : index
    %c0_22 = arith.constant 0 : index
    %38 = vector.load %arg0[%c0_21, %c1, %c0_22] : memref<8x2x32xf32, #tpu.memory_space<vmem>>, vector<8x1x32xf32>
    %39 = vector.shape_cast %38 : vector<8x1x32xf32> to vector<8x32xf32>
    %cst_23 = arith.constant dense<0.000000e+00> : vector<8x96xf32>
    %40 = tpu.matmul %39, %0, %cst_23 {dimension_numbers = #tpu.dot_dimension_numbers<[1], [0], [0], [1], [0, 0, 1, 1], [], []>} : vector<8x32xf32>, vector<32x96xf32>, vector<8x96xf32> -> vector<8x96xf32>
    %41 = vector.broadcast %1 : vector<1x96xf32> to vector<8x96xf32>
    %42 = arith.addf %40, %41 : vector<8x96xf32>
    %43 = vector.extract_strided_slice %42 {offsets = [0, 0], sizes = [8, 32], strides = [1, 1]} : vector<8x96xf32> to vector<8x32xf32>
    %44 = vector.broadcast %5 : f32 to vector<8x32xf32>
    %45 = arith.mulf %43, %44 : vector<8x32xf32>
    %46 = vector.extract_strided_slice %42 {offsets = [0, 32], sizes = [8, 32], strides = [1, 1]} : vector<8x96xf32> to vector<8x32xf32>
    %47 = vector.extract_strided_slice %42 {offsets = [0, 64], sizes = [8, 32], strides = [1, 1]} : vector<8x96xf32> to vector<8x32xf32>
    %cst_24 = arith.constant dense<0.000000e+00> : vector<8x8xf32>
    %48 = tpu.matmul %45, %46, %cst_24 {dimension_numbers = #tpu.dot_dimension_numbers<[1], [1], [0], [0], [0, 0, 1, 0], [], []>} : vector<8x32xf32>, vector<8x32xf32>, vector<8x8xf32> -> vector<8x8xf32>
    %cst_25 = arith.constant dense<0xFF800000> : vector<8xf32>
    %49 = vector.multi_reduction <maximumf>, %48, %cst_25 [1] : vector<8x8xf32> to vector<8xf32>
    %50 = vector.shape_cast %49 : vector<8xf32> to vector<8x1xf32>
    %51 = vector.broadcast %50 : vector<8x1xf32> to vector<8x8xf32>
    %52 = arith.subf %48, %51 : vector<8x8xf32>
    %53 = math.exp %52 : vector<8x8xf32>
    %cst_26 = arith.constant dense<0.000000e+00> : vector<8xf32>
    %54 = vector.multi_reduction <add>, %53, %cst_26 [1] : vector<8x8xf32> to vector<8xf32>
    %55 = vector.shape_cast %54 : vector<8xf32> to vector<8x1xf32>
    %56 = tpu.reciprocal %55 {approx = true} : vector<8x1xf32> -> vector<8x1xf32>
    %57 = arith.mulf %55, %56 : vector<8x1xf32>
    %cst_27 = arith.constant 2.000000e+00 : f32
    %58 = vector.broadcast %cst_27 : f32 to vector<8x1xf32>
    %59 = arith.subf %58, %57 : vector<8x1xf32>
    %60 = arith.mulf %56, %59 : vector<8x1xf32>
    %61 = vector.broadcast %60 : vector<8x1xf32> to vector<8x8xf32>
    %62 = arith.mulf %53, %61 : vector<8x8xf32>
    %cst_28 = arith.constant dense<0.000000e+00> : vector<8x32xf32>
    %63 = tpu.matmul %62, %47, %cst_28 {dimension_numbers = #tpu.dot_dimension_numbers<[1], [0], [0], [1], [0, 0, 1, 1], [], []>} : vector<8x8xf32>, vector<8x32xf32>, vector<8x32xf32> -> vector<8x32xf32>
    %cst_29 = arith.constant dense<0.000000e+00> : vector<8x32xf32>
    %64 = tpu.matmul %63, %2, %cst_29 {dimension_numbers = #tpu.dot_dimension_numbers<[1], [0], [0], [1], [0, 0, 1, 1], [], []>} : vector<8x32xf32>, vector<32x32xf32>, vector<8x32xf32> -> vector<8x32xf32>
    %65 = vector.broadcast %3 : vector<1x32xf32> to vector<8x32xf32>
    %66 = arith.addf %64, %65 : vector<8x32xf32>
    %c0_30 = arith.constant 0 : index
    %c1_31 = arith.constant 1 : index
    %c0_32 = arith.constant 0 : index
    %67 = vector.load %arg5[%c0_30, %c1_31, %c0_32] : memref<8x2x32xf32, #tpu.memory_space<vmem>>, vector<8x1x32xf32>
    %68 = vector.shape_cast %67 : vector<8x1x32xf32> to vector<8x32xf32>
    %69 = vector.shape_cast %66 : vector<8x32xf32> to vector<8x1x32xf32>
    tpu.vector_store %arg5[%c0_30, %c1_31, %c0_32], %69 {strides = array<i32>} : memref<8x2x32xf32, #tpu.memory_space<vmem>>, vector<8x1x32xf32>,
    return
  }
}

</mosaic_0001>

<bundles_post_ra>
// kernel: self_attention_pallas.1
= control target key start
LH: loop header
LB: loop body
LE: loop exit
PB: predicated region body
PF: predicated region fallthrough
CT: control target
= control target key end

     0   :  { %v1058_v3 = vmov 0.0|0.0   ;;  %vm1059_vm0 = vmmov 0   ;;  %v1060_v6 = vmov 0.0   ;;  %vm54_vm1 = vcmask 1041409   ;;  %s1289_s0 = inlined_call_operand.vmem [shape: f32[8,2,32], index: 0, kind: input, shape index: {}]   ;;  %s1290_s1 = inlined_call_operand.vmem [shape: f32[32,96], index: 1, kind: input, shape index: {}]   ;;  %s1291_s2 = inlined_call_operand.vmem [shape: f32[1,96], index: 2, kind: input, shape index: {}]   ;;  %s1292_s3 = inlined_call_operand.vmem [shape: f32[32,32], index: 3, kind: input, shape index: {}]   ;;  %s1293_s4 = inlined_call_operand.vmem [shape: f32[1,32], index: 4, kind: input, shape index: {}]   ;;  %s1294_s5 = inlined_call_operand.hbm [shape: f32[8,2,32], index: 5, kind: output, shape index: {}]  }
   0x1   :  { %v21_v0 = vld [vmem:[%s1290_s1] sm:$0xff]  ;;  %v22_v1 = vld [vmem:[%s1290_s1 + $0x8] sm:$0xff]  ;;  %v23_v2 = vld [vmem:[%s1290_s1 + $0x10] sm:$0xff]  ;;  %993 = vmatprep.subr.bf16.mxu0 %v1058_v3  ;;  %937 = vmatprep.mubr.msk.f32.mxu0 %vm1059_vm0, %v1060_v6  ;;  %vm57_vm2 = vcmask 1042434   ;;  %vm60_vm3 = vcmask 1043459  }
   0x2   :  { %v1107_v4 = vpack.c.bf16 %v22_v1, %v21_v0  ;;  %v24_v5 = vld [vmem:[%s1290_s1 + $0x18] sm:$0xff]  ;;  %v32_v7 = vld [vmem:[%s1289_s0 + $0x2] sm:$0x1]  ;;  %v33_v8 = vld [vmem:[%s1289_s0 + $0x4] sm:$0x1]  ;;  %940 = vmatprep.subr.mxu1 %v1060_v6  ;;  %942 = vmatprep.mubr.msk.f32.mxu1 %vm1059_vm0, %v1060_v6 }
   0x3   :  { %v34_v9 = vld [vmem:[%s1289_s0 + $0x6] sm:$0x1]  ;;  %v35_v10 = vld [vmem:[%s1289_s0 + $0x8] sm:$0x1]  ;;  %v1130_v11 = vpack.c.bf16 %v24_v5, %v23_v2  ;;  %v31_v12 = vld [vmem:[%s1289_s0] sm:$0x1] }
   0x4   :  { %995 = vmatpush3.bf16.msra.mxu0 %v1107_v4  ;;  %v36_v13 = vld [vmem:[%s1289_s0 + $0xa] sm:$0x1]  ;;  %v37_v14 = vld [vmem:[%s1289_s0 + $0xc] sm:$0x1]  ;;  %v53_v15 = vrot.slane %v32_v7, 7  ;;  %v56_v16 = vrot.slane %v33_v8, 6 }
   0x5   :  { %996 = vmatprep.subr.bf16.mxu0 %v1058_v3  ;;  %v59_v17 = vrot.slane %v34_v9, 5  ;;  %v38_v18 = vld [vmem:[%s1289_s0 + $0xe] sm:$0x1]  ;;  %v62_v19 = vrot.slane %v35_v10, 4 }
   0x6   :  { %10 = vsyncpa [#allocation3], 0  ;;  %v55_v20 = vsel %vm54_vm1, %v53_v15, %v31_v12  ;;  %vm63_vm4 = vcmask 1044484   ;;  %v65_v21 = vrot.slane %v36_v13, 3  ;;  %vm66_vm5 = vcmask 1045509   ;;  %s1061_s18 = smov 96  }
   0x7   :  { %v58_v22 = vsel %vm57_vm2, %v56_v16, %v55_v20  ;;  %v68_v23 = vrot.slane %v37_v14, 2  ;;  %vm69_vm6 = vcmask 1046534   ;;  %v71_v25 = vrot.slane %v38_v18, 1  ;;  %v1160_v30 = vld [vmem:[%s1291_s2] ss:$0 sm:$0xff]  ;;  %s1062_s2 = smov 64  }
   0x8   :  { %998 = vmatpush3.bf16.msra.mxu0 %v1130_v11  ;;  %v61_v24 = vsel %vm60_vm3, %v59_v17, %v58_v22  ;;  %vm72_vm7 = vcmask 1047559   ;;  %vm74_vm8 = vcmask 261120   ;;  %vm226_vm9 = vcmask 64512   ;;  %v26_v44 = vld [vmem:[%s1292_s3] sm:$0xff]  ;;  %v27_v45 = vld [vmem:[%s1292_s3 + $0x8] sm:$0xff]  ;;  %v28_v46 = vld [vmem:[%s1292_s3 + $0x10] sm:$0xff] }
   0x9   :  { %999 = vmatprep.subr.bf16.mxu0 %v1058_v3  ;;  %v64_v26 = vsel %vm63_vm4, %v62_v19, %v61_v24  ;;  %v1000_v47 = vpack.c.bf16 %v27_v45, %v26_v44  ;;  %v29_v48 = vld [vmem:[%s1292_s3 + $0x18] sm:$0xff]  ;;  %v464_v51 = vld [vmem:[%s1289_s0 + $0x3] sm:$0x1]  ;;  %v465_v52 = vld [vmem:[%s1289_s0 + $0x5] sm:$0x1]  ;;  %vm454_vm10 = vcmask 253952  }
   0xa   :  { %v67_v27 = vsel %vm66_vm5, %v65_v21, %v64_v26  ;;  %v1003_v49 = vpack.c.bf16 %v29_v48, %v28_v46  ;;  %v479_v53 = vrot.slane %v464_v51, 7  ;;  %v463_v55 = vld [vmem:[%s1289_s0 + $0x1] sm:$0x1]  ;;  %v466_v56 = vld [vmem:[%s1289_s0 + $0x7] sm:$0x1]  ;;  %v481_v57 = vrot.slane %v465_v52, 6 }
   0xb   :  { %v70_v28 = vsel %vm69_vm6, %v68_v23, %v67_v27  ;;  %v467_v59 = vld [vmem:[%s1289_s0 + $0x9] sm:$0x1]  ;;  %v483_v60 = vrot.slane %v466_v56, 5  ;;  %v468_v0 = vld [vmem:[%s1289_s0 + $0xb] sm:$0x1] }
   0xc   :  { %v73_v29 = vsel %vm72_vm7, %v71_v25, %v70_v28  ;;  %v480_v58 = vsel %vm54_vm1, %v479_v53, %v463_v55  ;;  %v485_v1 = vrot.slane %v467_v59, 4  ;;  %v469_v7 = vld [vmem:[%s1289_s0 + $0xd] sm:$0x1]  ;;  %v487_v8 = vrot.slane %v468_v0, 3  ;;  %v470_v13 = vld [vmem:[%s1289_s0 + $0xf] sm:$0x1] }
   0xd   :  { %938 = vmatmul.mubr.msk.f32.vlgmr.msra.gmra.mrb[0].mxu0 %vm74_vm8, %v73_v29  ;;  %v482_v61 = vsel %vm57_vm2, %v481_v57, %v480_v58  ;;  %v489_v14 = vrot.slane %v469_v7, 2  ;;  %v491_v16 = vrot.slane %v470_v13, 1  ;;  %v1063_v24 = vmov 1966171168   ;;  %v894_v28 = vld [vmem:[%s1293_s4] ss:$0 sm:$0xff] }
   0xe   :  { %958 = vmatprep.mubr.msk.f32.mxu0 %vm1059_vm0, %v1060_v6  ;;  %1001 = vmatpush3.bf16.msra.mxu0 %v1000_v47  ;;  %v484_v2 = vsel %vm60_vm3, %v483_v60, %v482_v61  ;;  %v401_v25 = vlaneseq  ;;  %s1064_s4 = smov [#allocation2]  }
   0xf   :  { %1002 = vmatprep.subr.bf16.mxu0 %v1058_v3  ;;  %v486_v10 = vsel %vm63_vm4, %v485_v1, %v484_v2  ;;  %s878_s17 = sshll.u32 %s1064_s4, 4  ;;  %s879_s17 = int_to_ptr.vmem [resolvable:$true] %s878_s17 }
  0x10   :  { %v488_v15 = vsel %vm66_vm5, %v487_v8, %v486_v10  ;;  %v402_v27 = vshrl.u32 %v401_v25, 7  ;;  %p1039_p1 = scmp.lt.s32.totalorder %s879_s17, %s879_s17 }
  0x11   :  { %v490_v17 = vsel %vm69_vm6, %v489_v14, %v488_v15 }
  0x12   :  { %1004 = vmatpush3.bf16.msra.mxu0 %v1003_v49  ;;  %v492_v18 = vsel %vm72_vm7, %v491_v16, %v490_v17 }
  0x13   :  { %1011 = vmatprep.subr.bf16.mxu0 %v1058_v3 }
  0xe0   :  { %v143_v31 = vpop.f32.mrb[0].mxu0 }
  0xe1   :  { %v144_v32 = vadd.f32 %v1160_v30, %v143_v31  ;;  %v939_v33 = vpop.f32.mrb[1].mxu0 }
  0xe3   :  { %149 = vrot.lane.b32.xlu0 %v144_v32, %s1061_s18  ;;  %v147_v35 = vmul.f32 0.17677669, %v144_v32 }
 0x155   :  { %v150_v34 = vpop.permute.xlu0 %149 }
 0x156   :  { %941 = vmatpush3.xpose.msk.msra.mxu1 %vm74_vm8, %v150_v34 }
 0x157   :  { %945 = vmatprep.subr.mxu1 %v1060_v6 }
 0x159   :  { %943 = vmatmul.mubr.msk.f32.vlgmr.msra.gmra.mrb[0].mxu1 %vm74_vm8, %v147_v35 }
 0x15a   :  { %947 = vmatprep.mubr.msk.f32.mxu1 %vm1059_vm0, %v1060_v6 }
 0x22c   :  { %v222_v36 = vpop.f32.mrb[0].mxu1 }
 0x22d   :  { %v944_v37 = vpop.f32.mrb[1].mxu1  ;;  %v227_v38 = vsel %vm226_vm9, %v222_v36, -inf }
 0x22e   :  { %228 = vmax.xlane.f32.xlu0 %v227_v38 }
 0x2bb   :  { %v229_v39 = vpop.xlane.xlu0 %228 }
 0x2bc   :  { %v230_v40 = vsub.f32 %v222_v36, %v229_v39 }
 0x2be   :  { %v231_v41 = vmul.f32 1.442695, %v230_v40 }
 0x2c0   :  { %1026 = vpow2.f32 %v231_v41 }
 0x2ca   :  { %v1027_v42 = vpop.eup %1026 }
 0x2cb   :  { %v233_v43 = vsel %vm226_vm9, %v1027_v42, 0.0 }
 0x2cc   :  { %234 = vadd.xlane.f32.xlu1 %v233_v43 }
 0x2dd   :  { %241 = vrot.lane.b32.xlu1 %v144_v32, %s1062_s2 }
 0x359   :  { %v235_v50 = vpop.xlane.xlu1 %234 }
 0x35a   :  { %1028 = vrcp.f32 %v235_v50 }
 0x35d   :  { %v242_v54 = vpop.permute.xlu1 %241 }
 0x35e   :  { %946 = vmatpush3.msra.mxu1 %v242_v54 }
 0x35f   :  { %1005 = vmatprep.subr.bf16.mxu1 %v1058_v3 }
 0x364   :  { %v1029_v62 = vpop.eup %1028 }
 0x365   :  { %v237_v63 = vmul.f32 %v1029_v62, %v235_v50 }
 0x367   :  { %v238_v5 = vsub.f32 2.0, %v237_v63 }
 0x369   :  { %v239_v9 = vmul.f32 %v1029_v62, %v238_v5 }
 0x36b   :  { %v240_v12 = vmul.f32 %v1027_v42, %v239_v9 }
 0x36d   :  { %948 = vmatmul.mubr.msk.f32.vlgmr.msra.gmra.mrb[2].mxu1 %vm226_vm9, %v240_v12 }
 0x36e   :  { %1007 = vmatpush3.bf16.msra.mxu1 %v1107_v4  ;;  %969 = vmatprep.mubr.msk.f32.mxu1 %vm1059_vm0, %v1060_v6 }
 0x36f   :  { %1008 = vmatprep.subr.bf16.mxu1 %v1058_v3 }
 0x372   :  { %1010 = vmatpush3.bf16.msra.mxu1 %v1130_v11 }
 0x373   :  { %972 = vmatprep.subr.mxu1 %v1060_v6 }
 0x375   :  { %970 = vmatmul.mubr.msk.f32.vlgmr.msra.gmra.mrb[4].mxu1 %vm74_vm8, %v492_v18 }
 0x376   :  { %974 = vmatprep.mubr.msk.f32.mxu1 %vm1059_vm0, %v1060_v6 }
 0x440   :  { %v313_v4 = vpop.f32.mrb[2].mxu1 }
 0x441   :  { %v949_v19 = vpop.f32.mrb[3].mxu1  ;;  %959 = vmatmul.mubr.msk.f32.vlgmr.msra.gmra.mrb[2].mxu0 %vm74_vm8, %v313_v4 }
 0x442   :  { %1013 = vmatpush3.bf16.msra.mxu0 %v1000_v47  ;;  %990 = vmatprep.mubr.msk.f32.mxu0 %vm1059_vm0, %v1060_v6 }
 0x443   :  { %1014 = vmatprep.subr.bf16.mxu0 %v1058_v3  ;;  %v399_v3 = vunpack.c.l.s4 %v1063_v24 }
 0x445   :  { %v400_v26 = vunpack.c.0.s8 %v399_v3 }
 0x446   :  { %1016 = vmatpush3.bf16.msra.mxu0 %v1003_v49 }
 0x447   :  { %v1242_v29 = vsub.s32 %v400_v26, %v402_v27 }
 0x448   :  { %v561_v11 = vpop.f32.mrb[4].mxu1 }
 0x449   :  { %v562_v20 = vadd.f32 %v1160_v30, %v561_v11  ;;  %v971_v21 = vpop.f32.mrb[5].mxu1 }
 0x44b   :  { %567 = vrot.lane.b32.xlu1 %v562_v20, %s1061_s18  ;;  %v565_v23 = vmul.f32 0.17677669, %v562_v20  ;;  %s1034_s18 = scalar_lea.vmem %s879_s17, 256 }
 0x44c   :  { %p1035_p0 = scmp.ne.s32.totalorder %s879_s17, %s1034_s18  ;;  %p1040_p2 = scmp.lt.s32.totalorder %s1034_s18, %s1034_s18 }
 0x44e   :  { %p1041_p3 = por %p1040_p2, %p1039_p1 }
 0x450   :  { %p1042_p4 = pnand %p1041_p3, %p1035_p0 }
 0x4bd   :  { %v568_v22 = vpop.permute.xlu1 %567 }
 0x4be   :  { %973 = vmatpush3.xpose.msk.msra.mxu1 %vm74_vm8, %v568_v22 }
 0x4bf   :  { %977 = vmatprep.subr.mxu1 %v1060_v6 }
 0x4c1   :  { %975 = vmatmul.mubr.msk.f32.vlgmr.msra.gmra.mrb[6].mxu1 %vm74_vm8, %v565_v23 }
 0x4c2   :  { %979 = vmatprep.mubr.msk.f32.mxu1 %vm1059_vm0, %v1060_v6 }
 0x514   :  { %v392_v30 = vpop.f32.mrb[2].mxu0 }
 0x515   :  { %v393_v31 = vadd.f32 %v894_v28, %v392_v30  ;;  %v960_v32 = vpop.f32.mrb[3].mxu0 }
 0x517   :  { %v397_v33 = vcombine.high %v393_v31, %v393_v31  ;;  %v404_v34 = vrot.slane %v393_v31, %v1242_v29 }
 0x519   :  { %v411_v6 = vrot.slane %v397_v33, %v1242_v29  ;;  %v412_v35 = vcombine.high %v404_v34, %v404_v34  ;;  %v420_v36 = vrot.slane %v404_v34, %v1242_v29 }
 0x51b   :  { %v413_v37 = vcombine.high %v411_v6, %v411_v6  ;;  %v427_v38 = vrot.slane %v411_v6, %v1242_v29  ;;  %v434_v39 = vrot.slane %v412_v35, %v1242_v29  ;;  %v442_v40 = vcombine.high %v420_v36, %v420_v36  ;;  %455 = vst.msk [vmem:[#allocation2] sm:$0x1] %vm454_vm10, %v420_v36 }
 0x51d   :  { %v441_v41 = vrot.slane %v413_v37, %v1242_v29  ;;  %v443_v42 = vcombine.high %v427_v38, %v427_v38  ;;  %v444_v43 = vcombine.high %v434_v39, %v434_v39  ;;  %456 = vst.msk [vmem:[#allocation2 + $0x2] sm:$0x1] %vm454_vm10, %v434_v39  ;;  %457 = vst.msk [vmem:[#allocation2 + $0x4] sm:$0x1] %vm454_vm10, %v442_v40 }
 0x51e   :  { %459 = vst.msk [vmem:[#allocation2 + $0x8] sm:$0x1] %vm454_vm10, %v427_v38 }
 0x51f   :  { %v445_v44 = vcombine.high %v441_v41, %v441_v41  ;;  %458 = vst.msk [vmem:[#allocation2 + $0x6] sm:$0x1] %vm454_vm10, %v444_v43  ;;  %460 = vst.msk [vmem:[#allocation2 + $0xa] sm:$0x1] %vm454_vm10, %v441_v41 }
 0x520   :  { %461 = vst.msk [vmem:[#allocation2 + $0xc] sm:$0x1] %vm454_vm10, %v443_v42 }
 0x521   :  { %462 = vst.msk [vmem:[#allocation2 + $0xe] sm:$0x1] %vm454_vm10, %v445_v44 }
 0x594   :  { %v640_v45 = vpop.f32.mrb[6].mxu1 }
 0x595   :  { %v976_v46 = vpop.f32.mrb[7].mxu1  ;;  %v644_v47 = vsel %vm226_vm9, %v640_v45, -inf }
 0x596   :  { %645 = vmax.xlane.f32.xlu1 %v644_v47 }
 0x623   :  { %v646_v48 = vpop.xlane.xlu1 %645 }
 0x624   :  { %v647_v49 = vsub.f32 %v640_v45, %v646_v48 }
 0x626   :  { %v648_v50 = vmul.f32 1.442695, %v647_v49 }
 0x628   :  { %1030 = vpow2.f32 %v648_v50 }
 0x632   :  { %v1031_v51 = vpop.eup %1030 }
 0x633   :  { %v650_v52 = vsel %vm226_vm9, %v1031_v51, 0.0 }
 0x634   :  { %651 = vadd.xlane.f32.xlu0 %v650_v52 }
 0x64a   :  { %658 = vrot.lane.b32.xlu0 %v562_v20, %s1062_s2 }
 0x6c1   :  { %v652_v53 = vpop.xlane.xlu0 %651 }
 0x6c2   :  { %1032 = vrcp.f32 %v652_v53 }
 0x6c5   :  { %v659_v54 = vpop.permute.xlu0 %658 }
 0x6c6   :  { %978 = vmatpush3.msra.mxu1 %v659_v54 }
 0x6cc   :  { %v1033_v55 = vpop.eup %1032 }
 0x6cd   :  { %v654_v56 = vmul.f32 %v1033_v55, %v652_v53 }
 0x6cf   :  { %v655_v57 = vsub.f32 2.0, %v654_v56 }
 0x6d1   :  { %v656_v58 = vmul.f32 %v1033_v55, %v655_v57 }
 0x6d3   :  { %v657_v59 = vmul.f32 %v1031_v51, %v656_v58 }
 0x6d5   :  { %980 = vmatmul.mubr.msk.f32.vlgmr.msra.gmra.mrb[8].mxu1 %vm226_vm9, %v657_v59 }
 0x7a8   :  { %v730_v60 = vpop.f32.mrb[8].mxu1 }
 0x7a9   :  { %v981_v61 = vpop.f32.mrb[9].mxu1  ;;  %991 = vmatmul.mubr.msk.f32.vlgmr.msra.gmra.mrb[4].mxu0 %vm74_vm8, %v730_v60 }
 0x87c   :  { %v803_v62 = vpop.f32.mrb[4].mxu0 }
 0x87d   :  { %v804_v63 = vadd.f32 %v894_v28, %v803_v62  ;;  %v992_v0 = vpop.f32.mrb[5].mxu0 }
 0x87f   :  { %v808_v1 = vcombine.high %v804_v63, %v804_v63  ;;  %v815_v2 = vrot.slane %v804_v63, %v1242_v29 }
 0x881   :  { %v822_v5 = vrot.slane %v808_v1, %v1242_v29  ;;  %v823_v7 = vcombine.high %v815_v2, %v815_v2  ;;  %v831_v8 = vrot.slane %v815_v2, %v1242_v29 }
 0x883   :  { %v824_v9 = vcombine.high %v822_v5, %v822_v5  ;;  %v838_v10 = vrot.slane %v822_v5, %v1242_v29  ;;  %v845_v12 = vrot.slane %v823_v7, %v1242_v29  ;;  %v853_v13 = vcombine.high %v831_v8, %v831_v8  ;;  %865 = vst.msk [vmem:[#allocation2 + $0x1] sm:$0x1] %vm454_vm10, %v831_v8 }
 0x885   :  { %v852_v14 = vrot.slane %v824_v9, %v1242_v29  ;;  %v854_v15 = vcombine.high %v838_v10, %v838_v10  ;;  %v855_v16 = vcombine.high %v845_v12, %v845_v12  ;;  %866 = vst.msk [vmem:[#allocation2 + $0x3] sm:$0x1] %vm454_vm10, %v845_v12  ;;  %867 = vst.msk [vmem:[#allocation2 + $0x5] sm:$0x1] %vm454_vm10, %v853_v13 }
 0x886   :  { %869 = vst.msk [vmem:[#allocation2 + $0x9] sm:$0x1] %vm454_vm10, %v838_v10 }
 0x887   :  { %v856_v17 = vcombine.high %v852_v14, %v852_v14  ;;  %868 = vst.msk [vmem:[#allocation2 + $0x7] sm:$0x1] %vm454_vm10, %v855_v16  ;;  %870 = vst.msk [vmem:[#allocation2 + $0xb] sm:$0x1] %vm454_vm10, %v852_v14 }
 0x888   :  { %871 = vst.msk [vmem:[#allocation2 + $0xd] sm:$0x1] %vm454_vm10, %v854_v15 }
 0x889   :  { %872 = vst.msk [vmem:[#allocation2 + $0xf] sm:$0x1] %vm454_vm10, %v856_v17 }
 0x88a   :  { %1045 = shalt.err (!%p1042_p4)
}
 0x88b   :  { %s1046_s20 = scalar_lea.hbm %s1294_s5, 256 }
 0x88c   :  { %p1047_p5 = scmp.ne.s32.totalorder %s1294_s5, %s1046_s20  ;;  %p1050_p6 = scmp.lt.u32.totalorder %s1046_s20, %s1294_s5 }
 0x88e   :  { %p1052_p7 = pnand %p1050_p6, %p1047_p5 }
 0x890   :  { %1055 = shalt.err (!%p1052_p7)
}
 0x891   :  { %s1065_s25 = smov 32   ;;  %s1066_s26 = smov 2  }
 0x892   :  { %884 = dma.vmem_to_hbm [thread:$0]  %s879_s17, 256, %s1294_s5, [#allocation3], %s1065_s25, %s1065_s25, %s1066_s26  }
 0x893   :  { %1056 = dma.done.wait [#allocation3], 256  }
 0x894   :  { %1057 = vsyncadd [#allocation3], 4294967040 }
 0x895   :  { %888 = vsyncpa [#allocation3], 1 }

</bundles_post_ra>
